<compile_context>
chip_gen: v6e
topology: v6e:2x2x1
jax: 0.10.0
libtpu: 0.0.40
codegen_flags: <defaults>
</compile_context>

<pallas_src>
import functools
import math

import jax
import jax.numpy as jnp
from jax.experimental import pallas as pl
from jax.experimental.pallas import tpu as pltpu

EPS = 1e-7
_MAX_TILE_HW = 16384  # lanes per HW tile (multiple of 128)


# ---------------------------------------------------------------------------
# Fused kernel: per-row (b,c) partial sums of  target*mask  and  acw-pixel*mask*bce
#   grid = (row_blocks, hw_tiles);  hw axis is the reduction axis.
# ---------------------------------------------------------------------------
def _fused_acw_bce_kernel(pred_ref, tgt_ref, m_ref, sc_ref, s_ref, *, nb, c):
    t = pl.program_id(1)

    @pl.when(t == 0)
    def _init():
        sc_ref[...] = jnp.zeros_like(sc_ref)
        s_ref[...] = jnp.zeros_like(s_ref)

    x = pred_ref[0].astype(jnp.float32)   # (ROWS, TILE)  logits
    z = tgt_ref[0].astype(jnp.float32)    # (ROWS, TILE)  targets
    m = m_ref[0].astype(jnp.float32)      # (NB,   TILE)  mask (one row per batch)

    # Broadcast each mask row over its C channel rows -> (ROWS, TILE).
    if nb == 1:
        m_full = jnp.broadcast_to(m, x.shape)
    else:
        m_full = jnp.concatenate(
            [m[i:i + 1] for i in range(nb) for _ in range(c)], axis=0)

    # Shared transcendental: e = exp(-|x|) feeds both sigmoid and stable BCE.
    e = jnp.exp(-jnp.abs(x))
    sig = jnp.where(x >= 0.0, 1.0, e) / (1.0 + e)                 # sigmoid(x)
    bce = jnp.maximum(x, 0.0) - x * z + jnp.log1p(e)              # BCE-with-logits
    pix = 1.0 + sig + z                                           # acw pixel (pre-mfb)

    sc_ref[...] += jnp.sum(z * m_full, axis=-1, keepdims=True)[None]
    s_ref[...] += jnp.sum(pix * (m_full * bce), axis=-1, keepdims=True)[None]


# ---------------------------------------------------------------------------
# Wrapper
# ---------------------------------------------------------------------------
def _round_up(x, m):
    return pl.cdiv(x, m) * m


def _pick_tile(hw_pad, max_tile=_MAX_TILE_HW):
    """Largest divisor of hw_pad that is a multiple of 128 and <= max_tile."""
    q = hw_pad // 128
    best = 1
    d = 1
    while d * d <= q:
        if q % d == 0:
            for cand in (d, q // d):
                if cand * 128 <= max_tile and cand > best:
                    best = cand
        d += 1
    return best * 128


@functools.partial(jax.jit, static_argnames=("itr",))
def mla_cw_bce_loss(pred_nchw, target_nchw, mask_nhw, prev_weight=0.0, itr=1):
    B, C, H, W = pred_nchw.shape
    HW = H * W

    # Sublane folding: NB batches per block so ROWS = NB*C = lcm(C, 8).
    NB = 8 // math.gcd(C, 8)
    ROWS = NB * C
    B_pad = _round_up(B, NB)
    hw_pad = _round_up(HW, 128)
    tile = _pick_tile(hw_pad)
    RB = B_pad // NB
    n_hw = hw_pad // tile

    # Keep HBM dtypes narrow; cast to f32 inside the kernel.
    mask = mask_nhw
    if not jnp.issubdtype(mask.dtype, jnp.floating):
        mask = mask.astype(jnp.float32)

    p2 = pred_nchw.reshape(B, C, HW)
    t2 = target_nchw.reshape(B, C, HW)
    m2 = mask.reshape(B, HW)
    if hw_pad != HW:  # padded tail has mask == 0 -> contributes zero to both sums
        p2 = jnp.pad(p2, ((0, 0), (0, 0), (0, hw_pad - HW)))
        t2 = jnp.pad(t2, ((0, 0), (0, 0), (0, hw_pad - HW)))
        m2 = jnp.pad(m2, ((0, 0), (0, hw_pad - HW)))
    if B_pad != B:  # padded batches have mask == 0 -> contribute zero
        p2 = jnp.pad(p2, ((0, B_pad - B), (0, 0), (0, 0)))
        t2 = jnp.pad(t2, ((0, B_pad - B), (0, 0), (0, 0)))
        m2 = jnp.pad(m2, ((0, B_pad - B), (0, 0)))

    p3 = p2.reshape(RB, ROWS, hw_pad)     # row j of a block = (batch j//C, class j%C)
    t3 = t2.reshape(RB, ROWS, hw_pad)
    m3 = m2.reshape(RB, NB, hw_pad)

    blk_in = pl.BlockSpec((1, ROWS, tile), lambda r, t: (r, 0, t))
    blk_m = pl.BlockSpec((1, NB, tile), lambda r, t: (r, 0, t))
    blk_out = pl.BlockSpec((1, ROWS, 1), lambda r, t: (r, 0, 0))

    blk_bytes = tile * (ROWS * (p3.dtype.itemsize + t3.dtype.itemsize)
                        + NB * m3.dtype.itemsize)
    vmem_limit = int(min(48 << 20, max(4 * blk_bytes + (6 << 20), 16 << 20)))

    kernel = functools.partial(_fused_acw_bce_kernel, nb=NB, c=C)
    sc_out, s_out = pl.pallas_call(
        kernel,
        grid_spec=pltpu.PrefetchScalarGridSpec(
            num_scalar_prefetch=0,
            grid=(RB, n_hw),
            in_specs=[blk_in, blk_in, blk_m],
            out_specs=[blk_out, blk_out],
        ),
        out_shape=(jax.ShapeDtypeStruct((RB, ROWS, 1), jnp.float32),
                   jax.ShapeDtypeStruct((RB, ROWS, 1), jnp.float32)),
        compiler_params=pltpu.CompilerParams(
            dimension_semantics=("parallel", "arbitrary"),
            vmem_limit_bytes=vmem_limit,
        ),
    )(p3, t3, m3)

    # ---- tiny (length-C) adaptive-class-weight math: plain JAX glue ----
    sum_class = jnp.sum(sc_out.reshape(B_pad, C), axis=0)     # (C,)
    s_sum = jnp.sum(s_out.reshape(B_pad, C), axis=0)          # (C,)

    weight_curr = sum_class / (jnp.sum(sum_class) + EPS)
    weight = (prev_weight * (itr - 1) + weight_curr) / itr    # running mean
    mfb = jnp.mean(weight) / (weight + EPS)
    mfb = mfb / (jnp.sum(mfb) + EPS)

    return jnp.dot(mfb, s_sum) / (B * H * W)


# ---------------------------------------------------------------------------
# Pure-JAX reference (mirrors the PyTorch forward, first call: itr=1, weight=0)
# ---------------------------------------------------------------------------
def _reference(pred, target, mask, prev_weight=0.0, itr=1):
    pred = pred.astype(jnp.float32)
    target = target.astype(jnp.float32)
    mask = mask.astype(jnp.float32)
    m4 = mask[:, None, :, :]
    sum_class = jnp.sum(target * m4, axis=(0, 2, 3))
    weight_curr = sum_class / (jnp.sum(sum_class) + EPS)
    weight = (prev_weight * (itr - 1) + weight_curr) / itr
    mfb = jnp.mean(weight) / (weight + EPS)
    mfb = mfb / (jnp.sum(mfb) + EPS)
    sig = jnp.exp(jax.nn.log_sigmoid(pred))
    acw_pixel = (1.0 + sig + target) * mfb[None, :, None, None]
    bce = (jnp.maximum(pred, 0.0) - pred * target
           + jnp.log1p(jnp.exp(-jnp.abs(pred))))
    return jnp.mean(jnp.sum(acw_pixel * (m4 * bce), axis=1))


if __name__ == "__main__":
    key = jax.random.PRNGKey(0)

    # Test 1: canonical small shape (no padding needed).
    B, C, H, W = 2, 4, 16, 16
    k1, k2, k3 = jax.random.split(key, 3)
    pred = jax.random.normal(k1, (B, C, H, W), dtype=jnp.float32)
    target = (jax.random.uniform(k2, (B, C, H, W)) > 0.5).astype(jnp.float32)
    mask = (jax.random.uniform(k3, (B, H, W)) > 0.3).astype(jnp.float32)

    out = jax.block_until_ready(mla_cw_bce_loss(pred, target, mask))
    ref = _reference(pred, target, mask)
    assert jnp.allclose(out, ref, rtol=5e-5, atol=1e-6), (out, ref)

    # Test 2: odd shapes exercising batch + HW padding paths.
    B2, C2, H2, W2 = 3, 4, 10, 13
    k4, k5, k6 = jax.random.split(jax.random.PRNGKey(1), 3)
    pred2 = jax.random.normal(k4, (B2, C2, H2, W2), dtype=jnp.float32)
    target2 = (jax.random.uniform(k5, (B2, C2, H2, W2)) > 0.5).astype(jnp.float32)
    mask2 = (jax.random.uniform(k6, (B2, H2, W2)) > 0.3).astype(jnp.float32)

    out2 = jax.block_until_ready(mla_cw_bce_loss(pred2, target2, mask2))
    ref2 = _reference(pred2, target2, mask2)
    assert jnp.allclose(out2, ref2, rtol=5e-5, atol=1e-6), (out2, ref2)

    print("KERNEL_OK")
</pallas_src>

<mosaic_0001>
module attributes {stable_mosaic.version = 11 : i64} {
  func.func @_fused_acw_bce_kernel(%arg0: i32, %arg1: i32, %arg2: memref<1x8x256xf32, #tpu.memory_space<vmem>>, %arg3: memref<1x8x256xf32, #tpu.memory_space<vmem>>, %arg4: memref<1x2x256xf32, #tpu.memory_space<vmem>>, %arg5: memref<1x8x1xf32, #tpu.memory_space<vmem>>, %arg6: memref<1x8x1xf32, #tpu.memory_space<vmem>>) attributes {dimension_semantics = [#tpu.dimension_semantics<parallel>, #tpu.dimension_semantics<arbitrary>], iteration_bounds = array<i64: 1, 1>, scalar_prefetch = 0 : i64, scratch_operands = 0 : i64, tpu.core_type = #tpu.core_type<tc>, window_params = [{transform_indices = @transform_0, window_bounds = array<i64: 1, 8, 256>}, {transform_indices = @transform_1, window_bounds = array<i64: 1, 8, 256>}, {transform_indices = @transform_2, window_bounds = array<i64: 1, 2, 256>}, {transform_indices = @transform_3, window_bounds = array<i64: 1, 8, 1>}, {transform_indices = @transform_4, window_bounds = array<i64: 1, 8, 1>}]} {
    %c0_i32 = arith.constant 0 : i32
    %0 = arith.cmpi eq, %arg1, %c0_i32 : i32
    %1 = arith.extui %0 : i1 to i32
    %c0_i32_0 = arith.constant 0 : i32
    %2 = arith.cmpi ne, %1, %c0_i32_0 : i32
    scf.if %2 {
      %cst_28 = arith.constant 0.000000e+00 : f32
      %53 = vector.broadcast %cst_28 : f32 to vector<1x8x1xf32>
      %c0_29 = arith.constant 0 : index
      %c0_30 = arith.constant 0 : index
      %c0_31 = arith.constant 0 : index
      %54 = vector.load %arg5[%c0_29, %c0_30, %c0_31] : memref<1x8x1xf32, #tpu.memory_space<vmem>>, vector<1x8x1xf32>
      tpu.vector_store %arg5[%c0_29, %c0_30, %c0_31], %53 {strides = array<i32>} : memref<1x8x1xf32, #tpu.memory_space<vmem>>, vector<1x8x1xf32>,
      %cst_32 = arith.constant 0.000000e+00 : f32
      %55 = vector.broadcast %cst_32 : f32 to vector<1x8x1xf32>
      %c0_33 = arith.constant 0 : index
      %c0_34 = arith.constant 0 : index
      %c0_35 = arith.constant 0 : index
      %56 = vector.load %arg6[%c0_33, %c0_34, %c0_35] : memref<1x8x1xf32, #tpu.memory_space<vmem>>, vector<1x8x1xf32>
      tpu.vector_store %arg6[%c0_33, %c0_34, %c0_35], %55 {strides = array<i32>} : memref<1x8x1xf32, #tpu.memory_space<vmem>>, vector<1x8x1xf32>,
    } else {
    }
    %c0 = arith.constant 0 : index
    %c0_1 = arith.constant 0 : index
    %c0_2 = arith.constant 0 : index
    %3 = vector.load %arg2[%c0, %c0_1, %c0_2] : memref<1x8x256xf32, #tpu.memory_space<vmem>>, vector<1x8x256xf32>
    %4 = vector.shape_cast %3 : vector<1x8x256xf32> to vector<8x256xf32>
    %c0_3 = arith.constant 0 : index
    %c0_4 = arith.constant 0 : index
    %c0_5 = arith.constant 0 : index
    %5 = vector.load %arg3[%c0_3, %c0_4, %c0_5] : memref<1x8x256xf32, #tpu.memory_space<vmem>>, vector<1x8x256xf32>
    %6 = vector.shape_cast %5 : vector<1x8x256xf32> to vector<8x256xf32>
    %c0_6 = arith.constant 0 : index
    %c0_7 = arith.constant 0 : index
    %c0_8 = arith.constant 0 : index
    %7 = vector.load %arg4[%c0_6, %c0_7, %c0_8] : memref<1x2x256xf32, #tpu.memory_space<vmem>>, vector<1x2x256xf32>
    %8 = vector.shape_cast %7 : vector<1x2x256xf32> to vector<2x256xf32>
    %9 = vector.extract_strided_slice %8 {offsets = [0, 0], sizes = [1, 256], strides = [1, 1]} : vector<2x256xf32> to vector<1x256xf32>
    %10 = vector.extract_strided_slice %8 {offsets = [0, 0], sizes = [1, 256], strides = [1, 1]} : vector<2x256xf32> to vector<1x256xf32>
    %11 = vector.extract_strided_slice %8 {offsets = [0, 0], sizes = [1, 256], strides = [1, 1]} : vector<2x256xf32> to vector<1x256xf32>
    %12 = vector.extract_strided_slice %8 {offsets = [0, 0], sizes = [1, 256], strides = [1, 1]} : vector<2x256xf32> to vector<1x256xf32>
    %13 = vector.extract_strided_slice %8 {offsets = [1, 0], sizes = [1, 256], strides = [1, 1]} : vector<2x256xf32> to vector<1x256xf32>
    %14 = vector.extract_strided_slice %8 {offsets = [1, 0], sizes = [1, 256], strides = [1, 1]} : vector<2x256xf32> to vector<1x256xf32>
    %15 = vector.extract_strided_slice %8 {offsets = [1, 0], sizes = [1, 256], strides = [1, 1]} : vector<2x256xf32> to vector<1x256xf32>
    %16 = vector.extract_strided_slice %8 {offsets = [1, 0], sizes = [1, 256], strides = [1, 1]} : vector<2x256xf32> to vector<1x256xf32>
    %17 = tpu.concatenate %9, %10, %11, %12, %13, %14, %15, %16 in 0 : vector<1x256xf32>, vector<1x256xf32>, vector<1x256xf32>, vector<1x256xf32>, vector<1x256xf32>, vector<1x256xf32>, vector<1x256xf32>, vector<1x256xf32> -> vector<8x256xf32>
    %18 = math.absf %4 : vector<8x256xf32>
    %cst = arith.constant 0.000000e+00 : f32
    %19 = vector.broadcast %cst : f32 to vector<8x256xf32>
    %20 = arith.subf %19, %18 : vector<8x256xf32>
    %21 = math.exp %20 : vector<8x256xf32>
    %cst_9 = arith.constant 0.000000e+00 : f32
    %22 = vector.broadcast %cst_9 : f32 to vector<8x256xf32>
    %23 = arith.cmpf oge, %4, %22 : vector<8x256xf32>
    %cst_10 = arith.constant 1.000000e+00 : f32
    %24 = vector.broadcast %cst_10 : f32 to vector<8x256xf32>
    %25 = arith.select %23, %24, %21 : vector<8x256xi1>, vector<8x256xf32>
    %cst_11 = arith.constant 1.000000e+00 : f32
    %26 = vector.broadcast %cst_11 : f32 to vector<8x256xf32>
    %27 = arith.addf %26, %21 : vector<8x256xf32>
    %28 = arith.divf %25, %27 : vector<8x256xf32>
    %cst_12 = arith.constant 0.000000e+00 : f32
    %29 = vector.broadcast %cst_12 : f32 to vector<8x256xf32>
    %30 = arith.maximumf %4, %29 : vector<8x256xf32>
    %31 = arith.mulf %4, %6 : vector<8x256xf32>
    %32 = arith.subf %30, %31 : vector<8x256xf32>
    %33 = math.log1p %21 : vector<8x256xf32>
    %34 = arith.addf %32, %33 : vector<8x256xf32>
    %cst_13 = arith.constant 1.000000e+00 : f32
    %35 = vector.broadcast %cst_13 : f32 to vector<8x256xf32>
    %36 = arith.addf %35, %28 : vector<8x256xf32>
    %37 = arith.addf %36, %6 : vector<8x256xf32>
    %c0_14 = arith.constant 0 : index
    %c0_15 = arith.constant 0 : index
    %c0_16 = arith.constant 0 : index
    %38 = vector.load %arg5[%c0_14, %c0_15, %c0_16] : memref<1x8x1xf32, #tpu.memory_space<vmem>>, vector<1x8x1xf32>
    %39 = arith.mulf %6, %17 : vector<8x256xf32>
    %cst_17 = arith.constant dense<0.000000e+00> : vector<8xf32>
    %40 = vector.multi_reduction <add>, %39, %cst_17 [1] : vector<8x256xf32> to vector<8xf32>
    %41 = vector.shape_cast %40 : vector<8xf32> to vector<8x1xf32>
    %42 = vector.shape_cast %41 : vector<8x1xf32> to vector<1x8x1xf32>
    %43 = arith.addf %38, %42 : vector<1x8x1xf32>
    %c0_18 = arith.constant 0 : index
    %c0_19 = arith.constant 0 : index
    %c0_20 = arith.constant 0 : index
    %44 = vector.load %arg5[%c0_18, %c0_19, %c0_20] : memref<1x8x1xf32, #tpu.memory_space<vmem>>, vector<1x8x1xf32>
    tpu.vector_store %arg5[%c0_18, %c0_19, %c0_20], %43 {strides = array<i32>} : memref<1x8x1xf32, #tpu.memory_space<vmem>>, vector<1x8x1xf32>,
    %c0_21 = arith.constant 0 : index
    %c0_22 = arith.constant 0 : index
    %c0_23 = arith.constant 0 : index
    %45 = vector.load %arg6[%c0_21, %c0_22, %c0_23] : memref<1x8x1xf32, #tpu.memory_space<vmem>>, vector<1x8x1xf32>
    %46 = arith.mulf %17, %34 : vector<8x256xf32>
    %47 = arith.mulf %37, %46 : vector<8x256xf32>
    %cst_24 = arith.constant dense<0.000000e+00> : vector<8xf32>
    %48 = vector.multi_reduction <add>, %47, %cst_24 [1] : vector<8x256xf32> to vector<8xf32>
    %49 = vector.shape_cast %48 : vector<8xf32> to vector<8x1xf32>
    %50 = vector.shape_cast %49 : vector<8x1xf32> to vector<1x8x1xf32>
    %51 = arith.addf %45, %50 : vector<1x8x1xf32>
    %c0_25 = arith.constant 0 : index
    %c0_26 = arith.constant 0 : index
    %c0_27 = arith.constant 0 : index
    %52 = vector.load %arg6[%c0_25, %c0_26, %c0_27] : memref<1x8x1xf32, #tpu.memory_space<vmem>>, vector<1x8x1xf32>
    tpu.vector_store %arg6[%c0_25, %c0_26, %c0_27], %51 {strides = array<i32>} : memref<1x8x1xf32, #tpu.memory_space<vmem>>, vector<1x8x1xf32>,
    return
  }
  func.func @transform_0(%arg0: i32, %arg1: i32) -> (i32, i32, i32) {
    %c0_i32 = arith.constant 0 : i32
    %c0_i32_0 = arith.constant 0 : i32
    return %arg0, %c0_i32, %arg1 : i32, i32, i32
  }
  func.func @transform_1(%arg0: i32, %arg1: i32) -> (i32, i32, i32) {
    %c0_i32 = arith.constant 0 : i32
    %c0_i32_0 = arith.constant 0 : i32
    return %arg0, %c0_i32, %arg1 : i32, i32, i32
  }
  func.func @transform_2(%arg0: i32, %arg1: i32) -> (i32, i32, i32) {
    %c0_i32 = arith.constant 0 : i32
    %c0_i32_0 = arith.constant 0 : i32
    return %arg0, %c0_i32, %arg1 : i32, i32, i32
  }
  func.func @transform_3(%arg0: i32, %arg1: i32) -> (i32, i32, i32) {
    %c0_i32 = arith.constant 0 : i32
    %c0_i32_0 = arith.constant 0 : i32
    %c0_i32_1 = arith.constant 0 : i32
    return %arg0, %c0_i32, %c0_i32_0 : i32, i32, i32
  }
  func.func @transform_4(%arg0: i32, %arg1: i32) -> (i32, i32, i32) {
    %c0_i32 = arith.constant 0 : i32
    %c0_i32_0 = arith.constant 0 : i32
    %c0_i32_1 = arith.constant 0 : i32
    return %arg0, %c0_i32, %c0_i32_0 : i32, i32, i32
  }
}

</mosaic_0001>

<bundles_post_ra>
// kernel: mla_cw_bce_loss.1
= control target key start
LH: loop header
LB: loop body
LE: loop exit
PB: predicated region body
PF: predicated region fallthrough
CT: control target
= control target key end

     0   :  { %v29_v0 = vlaneseq  ;;  %vm20_vm0 = vcmask 7168   ;;  %v155_v7 = vmov 0.0   ;;  %vm55_vm1 = vcmask 1043456   ;;  %s230_s2 = inlined_call_operand.vmem [shape: f32[1,2,256], index: 2, kind: input, shape index: {}]   ;;  %s231_s0 = inlined_call_operand.vmem [shape: f32[1,8,256], index: 0, kind: input, shape index: {}]   ;;  %s232_s3 = inlined_call_operand.vmem [shape: f32[1,8,1], index: 3, kind: output, shape index: {0}]   ;;  %s233_s1 = inlined_call_operand.vmem [shape: f32[1,8,256], index: 1, kind: input, shape index: {}]   ;;  %s234_s4 = inlined_call_operand.vmem [shape: f32[1,8,1], index: 4, kind: output, shape index: {1}]  }
   0x1   :  { %v184_v2 = vld [vmem:[%s231_s0] sm:$0xff]  ;;  %v189_v3 = vld [vmem:[%s231_s0 + $0x8] sm:$0xff]  ;;  %21 = vst.msk [vmem:[%s232_s3] sm:$0xff] %vm20_vm0, %v155_v7  ;;  %vm58_vm2 = vcmask 1044480   ;;  %vm61_vm3 = vcmask 1045504   ;;  %vm64_vm4 = vcmask 1046528  }
   0x2   :  { %v30_v1 = vshrl.u32 %v29_v0, 7  ;;  %v27_v4 = vld [vmem:[%s230_s2] sm:$0xf]  ;;  %v67_v5 = vand.u32 2147483647, %v184_v2  ;;  %v26_v27 = vld [vmem:[%s233_s1 + $0x8] sm:$0xff] }
   0x3   :  { %v68_v6 = vand.u32 2147483647, %v189_v3  ;;  %v25_v26 = vld [vmem:[%s233_s1] sm:$0xff]  ;;  %22 = vst.msk [vmem:[%s234_s4] sm:$0xff] %vm20_vm0, %v155_v7  ;;  %vm75_vm5 = vcmp.ge.f32.partialorder %v184_v2, 0.0  ;;  %vm76_vm6 = vcmp.ge.f32.partialorder %v189_v3, 0.0  ;;  %v88_v46 = vmul.f32 %v26_v27, %v189_v3 }
   0x4   :  { %v31_v8 = vsub.s32 0, %v30_v1  ;;  %v35_v9 = vsub.s32 2, %v30_v1  ;;  %v41_v10 = vsub.s32 1, %v30_v1  ;;  %v45_v11 = vsub.s32 3, %v30_v1 }
   0x5   :  { %v69_v12 = vsub.f32 0.0, %v67_v5  ;;  %v70_v13 = vsub.f32 0.0, %v68_v6  ;;  %v85_v39 = vmax.f32 %v184_v2, 0.0  ;;  %v87_v41 = vmul.f32 %v25_v26, %v184_v2 }
   0x6   :  { %v32_v14 = vrot.slane %v27_v4, %v31_v8  ;;  %v36_v15 = vrot.slane %v27_v4, %v35_v9  ;;  %v42_v16 = vrot.slane %v27_v4, %v41_v10  ;;  %v46_v17 = vrot.slane %v27_v4, %v45_v11 }
   0x7   :  { %v71_v18 = vmul.f32 1.442695, %v69_v12  ;;  %v73_v19 = vmul.f32 1.442695, %v70_v13  ;;  %v86_v45 = vmax.f32 %v189_v3, 0.0  ;;  %v89_v54 = vsub.f32 %v85_v39, %v87_v41 }
   0x8   :  { %v56_v20 = vsel %vm55_vm1, %v32_v14, %v42_v16  ;;  %v57_v21 = vsel %vm55_vm1, %v36_v15, %v46_v17  ;;  %v115_v10 = vld [vmem:[%s232_s3] sm:$0xff] }
   0x9   :  { %v59_v22 = vsel %vm58_vm2, %v56_v20, %v42_v16  ;;  %v60_v23 = vsel %vm58_vm2, %v57_v21, %v46_v17  ;;  %143 = vpow2.f32 %v71_v18  ;;  %v90_v58 = vsub.f32 %v86_v45, %v88_v46 }
   0xa   :  { %v62_v24 = vsel %vm61_vm3, %v59_v22, %v42_v16  ;;  %v63_v25 = vsel %vm61_vm3, %v60_v23, %v46_v17  ;;  %145 = vpow2.f32 %v73_v19  ;;  %v124_v13 = vld [vmem:[%s234_s4] sm:$0xff] }
   0xb   :  { %v65_v28 = vsel %vm64_vm4, %v62_v24, %v42_v16  ;;  %v66_v29 = vsel %vm64_vm4, %v63_v25, %v46_v17 }
   0xc   :  { %v116_v30 = vmul.f32 %v65_v28, %v25_v26  ;;  %v117_v31 = vmul.f32 %v66_v29, %v26_v27 }
   0xe   :  { %v118_v32 = vadd.f32 %v117_v31, %v116_v30 }
  0x10   :  { %119 = vadd.xlane.f32.xlu0 %v118_v32 }
  0x16   :  { %v144_v33 = vpop.eup %143 }
  0x17   :  { %v146_v34 = vpop.eup %145  ;;  %v79_v35 = vadd.f32 1.0, %v144_v33  ;;  %v94_v37 = vmul.f32 -0.5, %v144_v33  ;;  %v97_v42 = vand.u32 2147483647, %v144_v33  ;;  %v77_v44 = vsel %vm75_vm5, 1.0, %v144_v33 }
  0x18   :  { %v80_v36 = vadd.f32 1.0, %v146_v34  ;;  %v103_v38 = vmul.f32 -0.5, %v146_v34  ;;  %v106_v47 = vand.u32 2147483647, %v146_v34  ;;  %v78_v48 = vsel %vm76_vm6, 1.0, %v146_v34 }
  0x19   :  { %147 = vrcp.f32 %v79_v35  ;;  %v95_v40 = vadd.f32 1.0, %v94_v37  ;;  %vm98_vm7 = vcmp.lt.f32.partialorder %v97_v42, 0.0004427343 }
  0x1a   :  { %149 = vrcp.f32 %v80_v36  ;;  %v104_v43 = vadd.f32 1.0, %v103_v38  ;;  %vm107_vm8 = vcmp.lt.f32.partialorder %v106_v47, 0.0004427343 }
  0x1b   :  { %151 = vlog2.f32 %v79_v35  ;;  %v96_v51 = vmul.f32 %v144_v33, %v95_v40 }
  0x1c   :  { %153 = vlog2.f32 %v80_v36  ;;  %v105_v55 = vmul.f32 %v146_v34, %v104_v43 }
  0x26   :  { %v148_v49 = vpop.eup %147 }
  0x27   :  { %v150_v50 = vpop.eup %149  ;;  %v82_v52 = vmul.f32 %v148_v49, %v77_v44 }
  0x28   :  { %v152_v53 = vpop.eup %151  ;;  %v84_v56 = vmul.f32 %v150_v50, %v78_v48 }
  0x29   :  { %v154_v57 = vpop.eup %153  ;;  %v93_v59 = vmul.f32 0.6931472, %v152_v53  ;;  %v111_v60 = vadd.f32 1.0, %v82_v52 }
  0x2a   :  { %v102_v61 = vmul.f32 0.6931472, %v154_v57  ;;  %v112_v62 = vadd.f32 1.0, %v84_v56 }
  0x2b   :  { %v99_v63 = vsel %vm98_vm7, %v96_v51, %v93_v59  ;;  %v113_v2 = vadd.f32 %v111_v60, %v25_v26 }
  0x2c   :  { %v108_v0 = vsel %vm107_vm8, %v105_v55, %v102_v61  ;;  %v109_v1 = vadd.f32 %v99_v63, %v89_v54  ;;  %v114_v4 = vadd.f32 %v112_v62, %v26_v27 }
  0x2d   :  { %v110_v3 = vadd.f32 %v108_v0, %v90_v58 }
  0x2e   :  { %v125_v5 = vmul.f32 %v109_v1, %v65_v28 }
  0x2f   :  { %v126_v6 = vmul.f32 %v110_v3, %v66_v29 }
  0x30   :  { %v127_v7 = vmul.f32 %v125_v5, %v113_v2 }
  0x31   :  { %v128_v8 = vmul.f32 %v126_v6, %v114_v4 }
  0x33   :  { %v129_v9 = vadd.f32 %v128_v8, %v127_v7 }
  0x35   :  { %130 = vadd.xlane.f32.xlu0 %v129_v9 }
  0x99   :  { %v120_v11 = vpop.xlane.xlu0 %119 }
  0x9a   :  { %v121_v12 = vadd.f32 %v120_v11, %v115_v10 }
  0x9c   :  { %123 = vst.msk [vmem:[%s232_s3] sm:$0xff] %vm20_vm0, %v121_v12 }
  0xbe   :  { %v131_v14 = vpop.xlane.xlu0 %130 }
  0xbf   :  { %v132_v15 = vadd.f32 %v131_v14, %v124_v13 }
  0xc1   :  { %133 = vst.msk [vmem:[%s234_s4] sm:$0xff] %vm20_vm0, %v132_v15 }

</bundles_post_ra>
